<compile_context>
chip_gen: v7x
topology: tpu7x:2x2x1
jax: 0.10.0
libtpu: 0.0.40
codegen_flags: <defaults>
</compile_context>

<pallas_src>
import jax
import jax.numpy as jnp
from jax.experimental import pallas as pl
from jax.experimental.pallas import tpu as pltpu


def _round_up(n, m):
    return ((n + m - 1) // m) * m


def mlp_kernel(x_ref, w_ref, b_ref, o_ref):
    # x_ref: (TM, 21), w_ref: (21, 16), b_ref: (1, 16), o_ref: (TM, 16)
    y = jnp.dot(x_ref[...], w_ref[...], preferred_element_type=jnp.float32)
    y = y + b_ref[...]
    o_ref[...] = jnp.maximum(y, 0.0).astype(o_ref.dtype)


def mlp_forward(x, w1, b1, w2, b2, w3, b3, *, max_tile_rows=512):
    """Forward pass equivalent to Linear->Linear->Linear->ReLU.

    Weights are stored as (in_features, out_features); biases as (1, out).
    """
    # Algebraic collapse of the purely-affine chain (exact same map as the
    # original module up to float re-association).
    w = w1 @ w2 @ w3                       # (21, 16)
    b = b1 @ w2 @ w3 + b2 @ w3 + b3        # (1, 16)

    B, in_f = x.shape
    out_f = w.shape[1]

    # Batch tile: multiple of 8 sublanes, capped so huge batches still pipeline.
    tm = min(max_tile_rows, _round_up(B, 8))
    b_pad = _round_up(B, tm)
    if b_pad != B:
        x = jnp.pad(x, ((0, b_pad - B), (0, 0)))

    out = pl.pallas_call(
        mlp_kernel,
        out_shape=jax.ShapeDtypeStruct((b_pad, out_f), jnp.float32),
        grid=(b_pad // tm,),
        in_specs=[
            pl.BlockSpec((tm, in_f), lambda i: (i, 0)),      # x: tiled over batch
            pl.BlockSpec((in_f, out_f), lambda i: (0, 0)),   # collapsed weight
            pl.BlockSpec((1, out_f), lambda i: (0, 0)),      # collapsed bias
        ],
        out_specs=pl.BlockSpec((tm, out_f), lambda i: (i, 0)),
        compiler_params=pltpu.CompilerParams(
            dimension_semantics=("parallel",)),
    )(x, w, b)

    return out[:B]


def init_linear_params(key, in_features, out_features):
    # Mimic torch.nn.Linear default init: U(-1/sqrt(fan_in), 1/sqrt(fan_in))
    kw, kb = jax.random.split(key)
    bound = 1.0 / (in_features ** 0.5)
    # Stored as (in_features, out_features) = transpose of torch's (out, in)
    w = jax.random.uniform(kw, (in_features, out_features), jnp.float32, -bound, bound)
    b = jax.random.uniform(kb, (1, out_features), jnp.float32, -bound, bound)
    return w, b


if __name__ == "__main__":
    key = jax.random.PRNGKey(0)
    k_x, k1, k2, k3 = jax.random.split(key, 4)

    B = 8
    x = jax.random.normal(k_x, (B, 21), jnp.float32)

    w1, b1 = init_linear_params(k1, 21, 21)
    w2, b2 = init_linear_params(k2, 21, 5)
    w3, b3 = init_linear_params(k3, 5, 16)

    out = mlp_forward(x, w1, b1, w2, b2, w3, b3)
    jax.block_until_ready(out)

    # Reference check against the un-collapsed three-layer chain (plain JAX).
    ref = jnp.maximum(((x @ w1 + b1) @ w2 + b2) @ w3 + b3, 0.0)
    assert out.shape == (B, 16)
    assert jnp.allclose(out, ref, atol=1e-4, rtol=1e-4), (
        float(jnp.max(jnp.abs(out - ref))))

    print("KERNEL_OK")
</pallas_src>

<mosaic_0001>
module attributes {stable_mosaic.version = 11 : i64} {
  func.func @mlp_kernel(%arg0: i32, %arg1: memref<8x21xf32, #tpu.memory_space<vmem>>, %arg2: memref<21x16xf32, #tpu.memory_space<vmem>>, %arg3: memref<1x16xf32, #tpu.memory_space<vmem>>, %arg4: memref<8x16xf32, #tpu.memory_space<vmem>>) attributes {dimension_semantics = [#tpu.dimension_semantics<parallel>], iteration_bounds = array<i64: 1>, scalar_prefetch = 0 : i64, scratch_operands = 0 : i64, tpu.core_type = #tpu.core_type<tc>, window_params = [{transform_indices = @transform_0, window_bounds = array<i64: 8, 21>}, {pipeline_mode = #tpu.pipeline_mode<synchronous>, transform_indices = @transform_1, window_bounds = array<i64: 21, 16>}, {pipeline_mode = #tpu.pipeline_mode<synchronous>, transform_indices = @transform_2, window_bounds = array<i64: 1, 16>}, {transform_indices = @transform_3, window_bounds = array<i64: 8, 16>}]} {
    %c0 = arith.constant 0 : index
    %c0_0 = arith.constant 0 : index
    %0 = vector.load %arg1[%c0, %c0_0] : memref<8x21xf32, #tpu.memory_space<vmem>>, vector<8x21xf32>
    %c0_1 = arith.constant 0 : index
    %c0_2 = arith.constant 0 : index
    %1 = vector.load %arg2[%c0_1, %c0_2] : memref<21x16xf32, #tpu.memory_space<vmem>>, vector<21x16xf32>
    %cst = arith.constant dense<0.000000e+00> : vector<8x16xf32>
    %2 = tpu.matmul %0, %1, %cst {dimension_numbers = #tpu.dot_dimension_numbers<[1], [0], [0], [1], [0, 0, 1, 1], [], []>} : vector<8x21xf32>, vector<21x16xf32>, vector<8x16xf32> -> vector<8x16xf32>
    %c0_3 = arith.constant 0 : index
    %c0_4 = arith.constant 0 : index
    %3 = vector.load %arg3[%c0_3, %c0_4] : memref<1x16xf32, #tpu.memory_space<vmem>>, vector<1x16xf32>
    %4 = vector.broadcast %3 : vector<1x16xf32> to vector<8x16xf32>
    %5 = arith.addf %2, %4 : vector<8x16xf32>
    %cst_5 = arith.constant 0.000000e+00 : f32
    %6 = vector.broadcast %cst_5 : f32 to vector<8x16xf32>
    %7 = arith.maximumf %5, %6 : vector<8x16xf32>
    %c0_6 = arith.constant 0 : index
    %c0_7 = arith.constant 0 : index
    %8 = vector.load %arg4[%c0_6, %c0_7] : memref<8x16xf32, #tpu.memory_space<vmem>>, vector<8x16xf32>
    tpu.vector_store %arg4[%c0_6, %c0_7], %7 {strides = array<i32>} : memref<8x16xf32, #tpu.memory_space<vmem>>, vector<8x16xf32>,
    return
  }
  func.func @transform_0(%arg0: i32) -> (i32, i32) {
    %c0_i32 = arith.constant 0 : i32
    %c0_i32_0 = arith.constant 0 : i32
    return %arg0, %c0_i32 : i32, i32
  }
  func.func @transform_1(%arg0: i32) -> (i32, i32) {
    %c0_i32 = arith.constant 0 : i32
    %c0_i32_0 = arith.constant 0 : i32
    %c0_i32_1 = arith.constant 0 : i32
    return %c0_i32, %c0_i32_0 : i32, i32
  }
  func.func @transform_2(%arg0: i32) -> (i32, i32) {
    %c0_i32 = arith.constant 0 : i32
    %c0_i32_0 = arith.constant 0 : i32
    %c0_i32_1 = arith.constant 0 : i32
    return %c0_i32, %c0_i32_0 : i32, i32
  }
  func.func @transform_3(%arg0: i32) -> (i32, i32) {
    %c0_i32 = arith.constant 0 : i32
    %c0_i32_0 = arith.constant 0 : i32
    return %arg0, %c0_i32 : i32, i32
  }
}

</mosaic_0001>

<bundles_post_ra>
// kernel: tpu_custom_call.1
= control target key start
LH: loop header
LB: loop body
LE: loop exit
PB: predicated region body
PF: predicated region fallthrough
CT: control target
= control target key end

     0   :  { %v168_v2 = vmov 0.0|0.0   ;;  %vm169_vm0 = vmmov 0   ;;  %v170_v4 = vmov 0.0   ;;  %s219_s0 = inlined_call_operand.vmem [shape: f32[8,21], index: 0, kind: input, shape index: {}]   ;;  %s220_s1 = inlined_call_operand.vmem [shape: f32[21,16], index: 1, kind: input, shape index: {}]   ;;  %s221_s2 = inlined_call_operand.vmem [shape: f32[1,16], index: 2, kind: input, shape index: {}]   ;;  %s222_s3 = inlined_call_operand.hbm [shape: f32[8,16], index: 3, kind: output, shape index: {}]  }
   0x1   :  { %v16_v0 = vld [vmem:[%s220_s1] sm:$0xff]  ;;  %v17_v1 = vld [vmem:[%s220_s1 + $0x8] sm:$0xff]  ;;  %137 = vmatprep.subr.bf16.mxu0 %v168_v2  ;;  %134 = vmatprep.mubr.msk.f32.mxu0 %vm169_vm0, %v170_v4 }
   0x2   :  { %v138_v3 = vpack.c.bf16 %v17_v1, %v16_v0 }
   0x3   :  { %8 = vsyncpa [#allocation3], 0  ;;  %v18_v5 = vld [vmem:[%s220_s1 + $0x10] sm:$0x1f]  ;;  %vm30_vm1 = vcmask 1044480   ;;  %v15_v6 = vld [vmem:[%s219_s0] sm:$0xff] }
   0x4   :  { %139 = vmatpush3.bf16.msra.mxu0 %v138_v3  ;;  %vm26_vm2 = vcmask 171008   ;;  %v121_v7 = vld [vmem:[%s221_s2] ss:$0 sm:$0xff]  ;;  %s171_s22 = smov [#allocation2]   ;;  %vm105_vm3 = vcmask 130048  }
   0x5   :  { %132 = vmatprep.subr.mxu0 %v170_v4  ;;  %s113_s23 = sshll.u32 %s171_s22, 4  ;;  %s114_s23 = int_to_ptr.vmem [resolvable:$true] %s113_s23 }
   0x6   :  { %s144_s1 = scalar_lea.vmem %s114_s23, 128  ;;  %p149_p1 = scmp.lt.s32.totalorder %s114_s23, %s114_s23 }
   0x7   :  { %p145_p0 = scmp.ne.s32.totalorder %s114_s23, %s144_s1  ;;  %p150_p2 = scmp.lt.s32.totalorder %s144_s1, %s144_s1 }
   0x8   :  { %133 = vmatpush3.msk.msra.mxu0 %vm30_vm1, %v18_v5 }
   0x9   :  { %135 = vmatmul.mubr.msk.f32.vlgmr.msra.gmra.mrb[0].mxu0 %vm26_vm2, %v15_v6  ;;  %p151_p3 = por %p150_p2, %p149_p1 }
   0xb   :  { %p152_p4 = pnand %p151_p3, %p145_p0 }
  0xdc   :  { %v100_v8 = vpop.f32.mrb[0].mxu0 }
  0xdd   :  { %v101_v9 = vadd.f32 %v121_v7, %v100_v8  ;;  %v136_v10 = vpop.f32.mrb[1].mxu0 }
  0xdf   :  { %v104_v11 = vmax.f32 %v101_v9, 0.0 }
  0xe1   :  { %106 = vst.msk [vmem:[#allocation2] sm:$0xff] %vm105_vm3, %v104_v11 }
  0xe2   :  { %155 = shalt.err (!%p152_p4)
}
  0xe3   :  { %s156_s2 = scalar_lea.hbm %s222_s3, 128 }
  0xe4   :  { %p157_p5 = scmp.ne.s32.totalorder %s222_s3, %s156_s2  ;;  %p160_p6 = scmp.lt.u32.totalorder %s156_s2, %s222_s3 }
  0xe6   :  { %p162_p7 = pnand %p160_p6, %p157_p5 }
  0xe8   :  { %165 = shalt.err (!%p162_p7)
}
  0xe9   :  { %116 = dma.vmem_to_hbm [thread:$0]  %s114_s23, 128, %s222_s3, [#allocation3]  }
  0xea   :  { %166 = dma.done.wait [#allocation3], 128  }
  0xeb   :  { %167 = vsyncadd [#allocation3], 4294967168 }
  0xec   :  { %120 = vsyncpa [#allocation3], 1 }

</bundles_post_ra>
